<compile_context>
chip_gen: v7x
topology: tpu7x:2x2x1
jax: 0.10.0
libtpu: 0.0.40
codegen_flags: <defaults>
</compile_context>

<pallas_src>
import functools

import jax
import jax.numpy as jnp
from jax.experimental import pallas as pl
from jax.experimental.pallas import tpu as pltpu

_LANE = 128


def _round_up(x, m):
    return ((x + m - 1) // m) * m


def _decoder_kernel(x_ref, w1_ref, b1_ref, w2_ref, b2_ref, w3_ref, b3_ref, o_ref):
    """Fused 3-layer MLP forward on one batch tile, batch on the lane/N axis."""
    # x tile: (TILE_B, 32) f32 -> bf16 in-kernel (avoids a separate XLA cast pass over x).
    x = x_ref[...].astype(w1_ref.dtype)

    # Layer 1: (64, 32) @ (TILE_B, 32)^T -> (64, TILE_B).  NT matmul on the MXU,
    # f32 accumulation; bias/ReLU epilogue in f32 (lane-dense vregs).
    h = jax.lax.dot_general(w1_ref[...], x, (((1,), (1,)), ((), ())),
                            preferred_element_type=jnp.float32)
    h = jnp.maximum(h + b1_ref[...], 0.0)

    # Layer 2: (64, 64) @ (64, TILE_B) -> (64, TILE_B).
    h = jnp.dot(w2_ref[...], h.astype(w2_ref.dtype),
                preferred_element_type=jnp.float32)
    h = jnp.maximum(h + b2_ref[...], 0.0)

    # Layer 3 (no activation, per MLP.__init__): (16, 64) @ (64, TILE_B) -> (16, TILE_B).
    out = jnp.dot(w3_ref[...], h.astype(w3_ref.dtype),
                  preferred_element_type=jnp.float32)
    o_ref[...] = (out + b3_ref[...]).astype(o_ref.dtype)


def prepare_decoder_params(params, compute_dtype=jnp.bfloat16):
    """One-time prep: keep PyTorch (out, in) weight layout, cast to bf16, bias -> (out, 1).

    params = ((W1, b1), (W2, b2), (W3, b3)) in PyTorch nn.Linear convention.
    """
    prepped = []
    for w, b in params:
        prepped.append((jnp.asarray(w, compute_dtype),                 # (out, in) bf16
                        jnp.asarray(b, jnp.float32).reshape(-1, 1)))   # (out, 1) f32
    return tuple(prepped)


def _pick_tiling(B, requested_tile_b):
    """Choose a 128-multiple batch tile, small padding, and >=2 grid steps when possible."""
    b_lane = _round_up(max(B, 1), _LANE)                       # batch is the lane axis
    tile = min(_round_up(max(requested_tile_b, _LANE), _LANE), b_lane)
    n = -(-b_lane // tile)                                     # cdiv
    if n == 1 and b_lane >= 2 * _LANE:
        n = 2                                                  # keep both v7x TCs busy
    tile = _round_up(-(-b_lane // n), _LANE)                   # even split -> small padding
    b_pad = n * tile
    return tile, b_pad, n


@functools.partial(jax.jit, static_argnames=("tile_b",))
def decoder_forward(x, prepped_params, tile_b=2048):
    """x: (B, in_dim) f32.  prepped_params from prepare_decoder_params().  Returns (B, out)."""
    (w1, b1), (w2, b2), (w3, b3) = prepped_params
    B, in_dim = x.shape
    d1, d2, out_dim = w1.shape[0], w2.shape[0], w3.shape[0]

    tile, b_pad, n_tiles = _pick_tiling(B, tile_b)

    # Pad only when needed (zeros; padded columns are independent and sliced off).
    xp = x if b_pad == B else jnp.pad(x, ((0, b_pad - B), (0, 0)))

    # Constant index_map -> parameters DMA'd once, VMEM-resident across grid steps.
    const = lambda a: pl.BlockSpec(a.shape, lambda i: (0, 0))

    flops = 2 * b_pad * (in_dim * d1 + d1 * d2 + d2 * out_dim)
    param_bytes = sum(int(a.size) * a.dtype.itemsize
                      for a in (w1, b1, w2, b2, w3, b3))
    bytes_accessed = (int(xp.size) * xp.dtype.itemsize
                      + b_pad * out_dim * 4
                      + param_bytes)
    cost = pl.CostEstimate(flops=flops, transcendentals=0,
                           bytes_accessed=bytes_accessed)

    out_t = pl.pallas_call(
        _decoder_kernel,
        out_shape=jax.ShapeDtypeStruct((out_dim, b_pad), jnp.float32),
        grid_spec=pltpu.PrefetchScalarGridSpec(
            num_scalar_prefetch=0,
            grid=(n_tiles,),
            in_specs=[
                pl.BlockSpec((tile, in_dim), lambda i: (i, 0)),   # x: tiled over batch
                const(w1), const(b1),
                const(w2), const(b2),
                const(w3), const(b3),
            ],
            out_specs=pl.BlockSpec((out_dim, tile), lambda i: (0, i)),
        ),
        compiler_params=pltpu.CompilerParams(
            dimension_semantics=("parallel",),          # megacore sharding on v7x
            vmem_limit_bytes=32 * 1024 * 1024,          # safe on v5e/v6e/v7x
        ),
        cost_estimate=cost,
    )(xp, w1, b1, w2, b2, w3, b3)

    out = out_t.T                                       # (b_pad, out_dim); tiny XLA transpose
    return out[:B] if b_pad != B else out


def _init_linear(key, in_features, out_features):
    """Deterministic init in PyTorch nn.Linear convention: W (out, in), b (out,)."""
    kw, kb = jax.random.split(key)
    bound = 1.0 / jnp.sqrt(in_features)
    w = jax.random.uniform(kw, (out_features, in_features), jnp.float32, -bound, bound)
    b = jax.random.uniform(kb, (out_features,), jnp.float32, -bound, bound)
    return w, b


def _reference_forward_f32(x, params):
    (w1, b1), (w2, b2), (w3, b3) = params
    h = jnp.maximum(x @ w1.T + b1, 0.0)
    h = jnp.maximum(h @ w2.T + b2, 0.0)
    return h @ w3.T + b3


def _reference_forward_bf16(x, params):
    """Mirrors the kernel's numerics: bf16 MXU inputs, f32 accumulation/epilogue."""
    bf = jnp.bfloat16
    (w1, b1), (w2, b2), (w3, b3) = params
    h = jnp.dot(x.astype(bf), w1.T.astype(bf), preferred_element_type=jnp.float32) + b1
    h = jnp.maximum(h, 0.0)
    h = jnp.dot(h.astype(bf), w2.T.astype(bf), preferred_element_type=jnp.float32) + b2
    h = jnp.maximum(h, 0.0)
    return jnp.dot(h.astype(bf), w3.T.astype(bf), preferred_element_type=jnp.float32) + b3


if __name__ == "__main__":
    hidden_channels = [32, 64, 64, 16]   # Decoder(hidden_channels, nn.ReLU())

    key = jax.random.PRNGKey(0)
    k_x, k1, k2, k3 = jax.random.split(key, 4)

    params = (
        _init_linear(k1, hidden_channels[0], hidden_channels[1]),
        _init_linear(k2, hidden_channels[1], hidden_channels[2]),
        _init_linear(k3, hidden_channels[2], hidden_channels[3]),
    )
    prepped = prepare_decoder_params(params)

    # Small batch: single-tile path.
    batch = 8
    x = jax.random.normal(k_x, (batch, hidden_channels[0]), jnp.float32)
    out = jax.block_until_ready(decoder_forward(x, prepped))
    assert out.shape == (batch, hidden_channels[-1])

    ref_bf16 = _reference_forward_bf16(x, params)
    assert jnp.allclose(out, ref_bf16, atol=1e-3, rtol=1e-3), \
        "Pallas output mismatch vs bf16-matched reference (small batch)"
    ref_f32 = _reference_forward_f32(x, params)
    assert jnp.allclose(out, ref_f32, atol=5e-2, rtol=5e-2), \
        "Pallas output mismatch vs f32 reference (small batch)"

    # Slightly larger batch with a small tile to exercise the multi-tile grid path.
    batch2 = 384
    x2 = jax.random.normal(k_x, (batch2, hidden_channels[0]), jnp.float32)
    out2 = jax.block_until_ready(decoder_forward(x2, prepped, tile_b=128))
    assert out2.shape == (batch2, hidden_channels[-1])
    assert jnp.allclose(out2, _reference_forward_bf16(x2, params), atol=1e-3, rtol=1e-3), \
        "Pallas output mismatch vs bf16-matched reference (multi-tile)"

    print("KERNEL_OK")
</pallas_src>

<mosaic_0001>
module attributes {stable_mosaic.version = 11 : i64} {
  func.func @_decoder_kernel(%arg0: i32, %arg1: memref<128x32xf32, #tpu.memory_space<vmem>>, %arg2: memref<64x32xbf16, #tpu.memory_space<vmem>>, %arg3: memref<64x1xf32, #tpu.memory_space<vmem>>, %arg4: memref<64x64xbf16, #tpu.memory_space<vmem>>, %arg5: memref<64x1xf32, #tpu.memory_space<vmem>>, %arg6: memref<16x64xbf16, #tpu.memory_space<vmem>>, %arg7: memref<16x1xf32, #tpu.memory_space<vmem>>, %arg8: memref<16x128xf32, #tpu.memory_space<vmem>>) attributes {dimension_semantics = [#tpu.dimension_semantics<parallel>], iteration_bounds = array<i64: 1>, scalar_prefetch = 0 : i64, scratch_operands = 0 : i64, tpu.core_type = #tpu.core_type<tc>, window_params = [{transform_indices = @transform_0, window_bounds = array<i64: 128, 32>}, {pipeline_mode = #tpu.pipeline_mode<synchronous>, transform_indices = @transform_1, window_bounds = array<i64: 64, 32>}, {pipeline_mode = #tpu.pipeline_mode<synchronous>, transform_indices = @transform_2, window_bounds = array<i64: 64, 1>}, {pipeline_mode = #tpu.pipeline_mode<synchronous>, transform_indices = @transform_3, window_bounds = array<i64: 64, 64>}, {pipeline_mode = #tpu.pipeline_mode<synchronous>, transform_indices = @transform_4, window_bounds = array<i64: 64, 1>}, {pipeline_mode = #tpu.pipeline_mode<synchronous>, transform_indices = @transform_5, window_bounds = array<i64: 16, 64>}, {pipeline_mode = #tpu.pipeline_mode<synchronous>, transform_indices = @transform_6, window_bounds = array<i64: 16, 1>}, {transform_indices = @transform_7, window_bounds = array<i64: 16, 128>}]} {
    %c0 = arith.constant 0 : index
    %c0_0 = arith.constant 0 : index
    %0 = vector.load %arg1[%c0, %c0_0] : memref<128x32xf32, #tpu.memory_space<vmem>>, vector<128x32xf32>
    %1 = arith.truncf %0 : vector<128x32xf32> to vector<128x32xbf16>
    %c0_1 = arith.constant 0 : index
    %c0_2 = arith.constant 0 : index
    %2 = vector.load %arg2[%c0_1, %c0_2] : memref<64x32xbf16, #tpu.memory_space<vmem>>, vector<64x32xbf16>
    %cst = arith.constant dense<0.000000e+00> : vector<64x128xf32>
    %3 = tpu.matmul %2, %1, %cst {dimension_numbers = #tpu.dot_dimension_numbers<[1], [1], [0], [0], [0, 0, 1, 0], [], []>} : vector<64x32xbf16>, vector<128x32xbf16>, vector<64x128xf32> -> vector<64x128xf32>
    %c0_3 = arith.constant 0 : index
    %c0_4 = arith.constant 0 : index
    %4 = vector.load %arg3[%c0_3, %c0_4] : memref<64x1xf32, #tpu.memory_space<vmem>>, vector<64x1xf32>
    %5 = vector.broadcast %4 : vector<64x1xf32> to vector<64x128xf32>
    %6 = arith.addf %3, %5 : vector<64x128xf32>
    %cst_5 = arith.constant 0.000000e+00 : f32
    %7 = vector.broadcast %cst_5 : f32 to vector<64x128xf32>
    %8 = arith.maximumf %6, %7 : vector<64x128xf32>
    %c0_6 = arith.constant 0 : index
    %c0_7 = arith.constant 0 : index
    %9 = vector.load %arg4[%c0_6, %c0_7] : memref<64x64xbf16, #tpu.memory_space<vmem>>, vector<64x64xbf16>
    %10 = arith.truncf %8 : vector<64x128xf32> to vector<64x128xbf16>
    %cst_8 = arith.constant dense<0.000000e+00> : vector<64x128xf32>
    %11 = tpu.matmul %9, %10, %cst_8 {dimension_numbers = #tpu.dot_dimension_numbers<[1], [0], [0], [1], [0, 0, 1, 1], [], []>} : vector<64x64xbf16>, vector<64x128xbf16>, vector<64x128xf32> -> vector<64x128xf32>
    %c0_9 = arith.constant 0 : index
    %c0_10 = arith.constant 0 : index
    %12 = vector.load %arg5[%c0_9, %c0_10] : memref<64x1xf32, #tpu.memory_space<vmem>>, vector<64x1xf32>
    %13 = vector.broadcast %12 : vector<64x1xf32> to vector<64x128xf32>
    %14 = arith.addf %11, %13 : vector<64x128xf32>
    %cst_11 = arith.constant 0.000000e+00 : f32
    %15 = vector.broadcast %cst_11 : f32 to vector<64x128xf32>
    %16 = arith.maximumf %14, %15 : vector<64x128xf32>
    %c0_12 = arith.constant 0 : index
    %c0_13 = arith.constant 0 : index
    %17 = vector.load %arg6[%c0_12, %c0_13] : memref<16x64xbf16, #tpu.memory_space<vmem>>, vector<16x64xbf16>
    %18 = arith.truncf %16 : vector<64x128xf32> to vector<64x128xbf16>
    %cst_14 = arith.constant dense<0.000000e+00> : vector<16x128xf32>
    %19 = tpu.matmul %17, %18, %cst_14 {dimension_numbers = #tpu.dot_dimension_numbers<[1], [0], [0], [1], [0, 0, 1, 1], [], []>} : vector<16x64xbf16>, vector<64x128xbf16>, vector<16x128xf32> -> vector<16x128xf32>
    %c0_15 = arith.constant 0 : index
    %c0_16 = arith.constant 0 : index
    %20 = vector.load %arg7[%c0_15, %c0_16] : memref<16x1xf32, #tpu.memory_space<vmem>>, vector<16x1xf32>
    %21 = vector.broadcast %20 : vector<16x1xf32> to vector<16x128xf32>
    %22 = arith.addf %19, %21 : vector<16x128xf32>
    %c0_17 = arith.constant 0 : index
    %c0_18 = arith.constant 0 : index
    %23 = vector.load %arg8[%c0_17, %c0_18] : memref<16x128xf32, #tpu.memory_space<vmem>>, vector<16x128xf32>
    tpu.vector_store %arg8[%c0_17, %c0_18], %22 {strides = array<i32>} : memref<16x128xf32, #tpu.memory_space<vmem>>, vector<16x128xf32>,
    return
  }
  func.func @transform_0(%arg0: i32) -> (i32, i32) {
    %c0_i32 = arith.constant 0 : i32
    %c0_i32_0 = arith.constant 0 : i32
    return %arg0, %c0_i32 : i32, i32
  }
  func.func @transform_1(%arg0: i32) -> (i32, i32) {
    %c0_i32 = arith.constant 0 : i32
    %c0_i32_0 = arith.constant 0 : i32
    %c0_i32_1 = arith.constant 0 : i32
    return %c0_i32, %c0_i32_0 : i32, i32
  }
  func.func @transform_2(%arg0: i32) -> (i32, i32) {
    %c0_i32 = arith.constant 0 : i32
    %c0_i32_0 = arith.constant 0 : i32
    %c0_i32_1 = arith.constant 0 : i32
    return %c0_i32, %c0_i32_0 : i32, i32
  }
  func.func @transform_3(%arg0: i32) -> (i32, i32) {
    %c0_i32 = arith.constant 0 : i32
    %c0_i32_0 = arith.constant 0 : i32
    %c0_i32_1 = arith.constant 0 : i32
    return %c0_i32, %c0_i32_0 : i32, i32
  }
  func.func @transform_4(%arg0: i32) -> (i32, i32) {
    %c0_i32 = arith.constant 0 : i32
    %c0_i32_0 = arith.constant 0 : i32
    %c0_i32_1 = arith.constant 0 : i32
    return %c0_i32, %c0_i32_0 : i32, i32
  }
  func.func @transform_5(%arg0: i32) -> (i32, i32) {
    %c0_i32 = arith.constant 0 : i32
    %c0_i32_0 = arith.constant 0 : i32
    %c0_i32_1 = arith.constant 0 : i32
    return %c0_i32, %c0_i32_0 : i32, i32
  }
  func.func @transform_6(%arg0: i32) -> (i32, i32) {
    %c0_i32 = arith.constant 0 : i32
    %c0_i32_0 = arith.constant 0 : i32
    %c0_i32_1 = arith.constant 0 : i32
    return %c0_i32, %c0_i32_0 : i32, i32
  }
  func.func @transform_7(%arg0: i32) -> (i32, i32) {
    %c0_i32 = arith.constant 0 : i32
    %c0_i32_0 = arith.constant 0 : i32
    return %c0_i32, %arg0 : i32, i32
  }
}

</mosaic_0001>

<bundles_post_ra>
// kernel: decoder_forward.1
= control target key start
LH: loop header
LB: loop body
LE: loop exit
PB: predicated region body
PF: predicated region fallthrough
CT: control target
= control target key end

     0   :  { %vm127_vm0 = vcmask 261120   ;;  %v593_v3 = vmov 0   ;;  %vm317_vm1 = vcmask 523264   ;;  %vm595_vm2 = vmmov 0   ;;  %s796_s0 = inlined_call_operand.vmem [shape: f32[128,32], index: 0, kind: input, shape index: {}]   ;;  %s797_s1 = inlined_call_operand.vmem [shape: bf16[64,32], index: 1, kind: input, shape index: {}]   ;;  %s798_s2 = inlined_call_operand.vmem [shape: f32[64,1], index: 2, kind: input, shape index: {}]   ;;  %s799_s4 = inlined_call_operand.vmem [shape: f32[64,1], index: 4, kind: input, shape index: {}]   ;;  %s800_s6 = inlined_call_operand.vmem [shape: f32[16,1], index: 6, kind: input, shape index: {}]   ;;  %s801_s3 = inlined_call_operand.vmem [shape: bf16[64,64], index: 3, kind: input, shape index: {}]   ;;  %s802_s5 = inlined_call_operand.vmem [shape: bf16[16,64], index: 5, kind: input, shape index: {}]   ;;  %s803_s7 = inlined_call_operand.vmem [shape: f32[16,128], index: 7, kind: output, shape index: {}]  }
   0x1   :  { %v27_v0 = vld [vmem:[%s796_s0] sm:$0xff]  ;;  %v28_v1 = vld [vmem:[%s796_s0 + $0x8] sm:$0xff]  ;;  %v29_v2 = vld [vmem:[%s796_s0 + $0x10] sm:$0xff]  ;;  %582 = vset.pattern.permute.xlu0 %v593_v3  ;;  %583 = vset.pattern.permute.xlu1 %v593_v3 }
   0x2   :  { %v43_v4 = vpack.c.bf16 %v28_v1, %v27_v0  ;;  %v30_v5 = vld [vmem:[%s796_s0 + $0x18] sm:$0xff]  ;;  %v31_v8 = vld [vmem:[%s796_s0 + $0x20] sm:$0xff]  ;;  %v32_v9 = vld [vmem:[%s796_s0 + $0x28] sm:$0xff] }
   0x3   :  { %v44_v6 = vpack.c.bf16 %v30_v5, %v29_v2  ;;  %v584_v10 = vld [vmem:[%s797_s1] sm:$0xff]   ;;  %v45_v12 = vpack.c.bf16 %v32_v9, %v31_v8  ;;  %v61_v14 = vld [vmem:[%s798_s2 + $0x10] sm:$0xff]  ;;  %v60_v15 = vld [vmem:[%s798_s2 + $0x8] sm:$0xff] }
   0x4   :  { %571 = vmatprep.subr.msk.bf16.mxu0 %vm127_vm0, %v43_v4  ;;  %v141_v7 = vsel %vm127_vm0, %v43_v4, 0  ;;  %535 = vmatprep.mubr.msk.bf16.mxu0 %vm127_vm0, %v584_v10  ;;  %v59_v13 = vld [vmem:[%s798_s2] sm:$0xff]  ;;  %v62_v16 = vld [vmem:[%s798_s2 + $0x18] sm:$0xff]  ;;  %v33_v17 = vld [vmem:[%s796_s0 + $0x30] sm:$0xff] }
   0x5   :  { %520 = vmatpush3.bf16.xpose.msra.mxu0 %v141_v7  ;;  %v144_v11 = vsel %vm127_vm0, %v44_v6, 0  ;;  %69 = vperm.xlu0 %582, %v59_v13   ;;  %v34_v18 = vld [vmem:[%s796_s0 + $0x38] sm:$0xff]  ;;  %v63_v19 = vld [vmem:[%s798_s2 + $0x20] sm:$0xff]  ;;  %v64_v20 = vld [vmem:[%s798_s2 + $0x28] sm:$0xff]  ;;  %v147_v21 = vsel %vm127_vm0, %v45_v12, 0 }
   0x6   :  { %572 = vmatprep.subr.msk.bf16.mxu0 %vm127_vm0, %v44_v6  ;;  %79 = vperm.xlu1 %583, %v61_v14   ;;  %v46_v22 = vpack.c.bf16 %v34_v18, %v33_v17  ;;  %v65_v23 = vld [vmem:[%s798_s2 + $0x30] sm:$0xff]  ;;  %v66_v24 = vld [vmem:[%s798_s2 + $0x38] sm:$0xff]  ;;  %v35_v25 = vld [vmem:[%s796_s0 + $0x40] sm:$0xff] }
   0x7   :  { %v36_v26 = vld [vmem:[%s796_s0 + $0x48] sm:$0xff]  ;;  %v249_v27 = vld [vmem:[%s799_s4] sm:$0xff]  ;;  %v251_v31 = vld [vmem:[%s799_s4 + $0x10] sm:$0xff] }
   0x8   :  { %v250_v28 = vld [vmem:[%s799_s4 + $0x8] sm:$0xff]  ;;  %v150_v29 = vsel %vm127_vm0, %v46_v22, 0  ;;  %v47_v30 = vpack.c.bf16 %v36_v26, %v35_v25  ;;  %v252_v32 = vld [vmem:[%s799_s4 + $0x18] sm:$0xff]  ;;  %v37_v33 = vld [vmem:[%s796_s0 + $0x50] sm:$0xff] }
   0x9   :  { %74 = vperm.xlu0 %582, %v60_v15   ;;  %v38_v34 = vld [vmem:[%s796_s0 + $0x58] sm:$0xff]  ;;  %v253_v35 = vld [vmem:[%s799_s4 + $0x20] sm:$0xff]  ;;  %v254_v36 = vld [vmem:[%s799_s4 + $0x28] sm:$0xff] }
   0xa   :  { %84 = vperm.xlu1 %583, %v62_v16   ;;  %v153_v37 = vsel %vm127_vm0, %v47_v30, 0  ;;  %v48_v38 = vpack.c.bf16 %v38_v34, %v37_v33  ;;  %v255_v39 = vld [vmem:[%s799_s4 + $0x30] sm:$0xff]  ;;  %v256_v40 = vld [vmem:[%s799_s4 + $0x38] sm:$0xff]  ;;  %v39_v41 = vld [vmem:[%s796_s0 + $0x60] sm:$0xff] }
   0xb   :  { %v40_v42 = vld [vmem:[%s796_s0 + $0x68] sm:$0xff]  ;;  %v409_v43 = vld [vmem:[%s800_s6] sm:$0xff]  ;;  %v41_v47 = vld [vmem:[%s796_s0 + $0x70] sm:$0xff] }
   0xc   :  { %v410_v44 = vld [vmem:[%s800_s6 + $0x8] sm:$0xff]  ;;  %v156_v45 = vsel %vm127_vm0, %v48_v38, 0  ;;  %v49_v46 = vpack.c.bf16 %v40_v42, %v39_v41  ;;  %v42_v48 = vld [vmem:[%s796_s0 + $0x78] sm:$0xff]  ;;  %v586_v53 = vld [vmem:[%s797_s1 + $0x10] sm:$0xff]  }
   0xd   :  { %522 = vmatpush3.bf16.xpose.msra.mxu0 %v144_v11  ;;  %89 = vperm.xlu0 %582, %v63_v19   ;;  %v50_v50 = vpack.c.bf16 %v42_v48, %v41_v47  ;;  %v585_v52 = vld [vmem:[%s797_s1 + $0x8] sm:$0xff]   ;;  %v587_v54 = vld [vmem:[%s797_s1 + $0x18] sm:$0xff]   ;;  %v588_v55 = vld [vmem:[%s801_s3] sm:$0xff]  }
   0xe   :  { %573 = vmatprep.subr.msk.bf16.mxu0 %vm127_vm0, %v45_v12  ;;  %94 = vperm.xlu1 %583, %v64_v20   ;;  %v159_v49 = vsel %vm127_vm0, %v49_v46, 0 }
   0xf   :  { %v162_v51 = vsel %vm127_vm0, %v50_v50, 0  ;;  %551 = vmatprep.mubr.msk.bf16.mxu1 %vm317_vm1, %v588_v55 }
  0x11   :  { %99 = vperm.xlu0 %582, %v65_v23  }
  0x12   :  { %104 = vperm.xlu1 %583, %v66_v24  }
  0x15   :  { %524 = vmatpush3.bf16.xpose.msra.mxu0 %v147_v21  ;;  %259 = vperm.xlu0 %582, %v249_v27  }
  0x16   :  { %574 = vmatprep.subr.msk.bf16.mxu0 %vm127_vm0, %v46_v22  ;;  %264 = vperm.xlu1 %583, %v250_v28   ;;  %v589_v28 = vld [vmem:[%s801_s3 + $0x8] sm:$0xff]  }
  0x19   :  { %269 = vperm.xlu0 %582, %v251_v31   ;;  %v594_v31 = vmov 0.0  }
  0x1a   :  { %274 = vperm.xlu1 %583, %v252_v32  }
  0x1d   :  { %526 = vmatpush3.bf16.xpose.msra.mxu0 %v150_v29  ;;  %279 = vperm.xlu0 %582, %v253_v35   ;;  %v590_v29 = vld [vmem:[%s801_s3 + $0x10] sm:$0xff]  }
  0x1e   :  { %575 = vmatprep.subr.msk.bf16.mxu0 %vm127_vm0, %v47_v30  ;;  %284 = vperm.xlu1 %583, %v254_v36   ;;  %v591_v30 = vld [vmem:[%s801_s3 + $0x18] sm:$0xff]  }
  0x21   :  { %289 = vperm.xlu0 %582, %v255_v39  }
  0x22   :  { %294 = vperm.xlu1 %583, %v256_v40  }
  0x25   :  { %528 = vmatpush3.bf16.xpose.msra.mxu0 %v153_v37  ;;  %413 = vperm.xlu0 %582, %v409_v43  }
  0x26   :  { %576 = vmatprep.subr.msk.bf16.mxu0 %vm127_vm0, %v48_v38  ;;  %418 = vperm.xlu1 %583, %v410_v44  }
  0x2d   :  { %530 = vmatpush3.bf16.xpose.msra.mxu0 %v156_v45 }
  0x2e   :  { %577 = vmatprep.subr.msk.bf16.mxu0 %vm127_vm0, %v49_v46 }
  0x35   :  { %532 = vmatpush3.bf16.xpose.msra.mxu0 %v159_v49 }
  0x36   :  { %578 = vmatprep.subr.msk.bf16.mxu0 %vm127_vm0, %v50_v50 }
  0x3d   :  { %534 = vmatpush3.bf16.xpose.msra.mxu0 %v162_v51 }
  0x44   :  { %536 = vmatmul.mubr.msk.bf16.vlgmr.msra.gmra.mrb[0].mxu0 %vm127_vm0, %v585_v52 }
  0x45   :  { %539 = vmatprep.mubr.msk.bf16.mxu0 %vm127_vm0, %v586_v53 }
  0x4c   :  { %540 = vmatmul.mubr.msk.bf16.gmra.mrb[4].mxu0 %vm127_vm0, %v587_v54 }
  0x84   :  { %v70_v56 = vpop.permute.xlu0 %69 }
  0x85   :  { %v80_v57 = vpop.permute.xlu1 %79 }
  0x88   :  { %v75_v58 = vpop.permute.xlu0 %74 }
  0x89   :  { %v85_v59 = vpop.permute.xlu1 %84 }
  0x8c   :  { %v90_v63 = vpop.permute.xlu0 %89 }
  0x8d   :  { %v95_v4 = vpop.permute.xlu1 %94 }
  0x90   :  { %v100_v11 = vpop.permute.xlu0 %99 }
  0x91   :  { %v105_v16 = vpop.permute.xlu1 %104 }
  0x94   :  { %v260_v32 = vpop.permute.xlu0 %259 }
  0x95   :  { %v265_v33 = vpop.permute.xlu1 %264 }
  0x98   :  { %v270_v34 = vpop.permute.xlu0 %269 }
  0x99   :  { %v275_v35 = vpop.permute.xlu1 %274 }
  0x9c   :  { %v280_v39 = vpop.permute.xlu0 %279 }
  0x9d   :  { %v285_v44 = vpop.permute.xlu1 %284 }
  0xa0   :  { %v290_v51 = vpop.permute.xlu0 %289 }
 0x117   :  { %v537_v60 = vpop.f32.mrb[0].mxu0 }
 0x118   :  { %v207_v61 = vadd.f32 %v537_v60, %v80_v57  ;;  %v198_v62 = vpop.f32.mrb[1].mxu0 }
 0x119   :  { %v199_v0 = vadd.f32 %v198_v62, %v70_v56  ;;  %v538_v1 = vpop.f32.mrb[2].mxu0  ;;  %v295_v56 = vpop.permute.xlu1 %294 }
 0x11a   :  { %v210_v2 = vadd.f32 %v538_v1, %v85_v59  ;;  %v201_v3 = vpop.f32.mrb[3].mxu0  ;;  %v231_v6 = vmax.f32 %v207_v61, 0.0 }
 0x11b   :  { %v202_v5 = vadd.f32 %v201_v3, %v75_v58  ;;  %v229_v8 = vmax.f32 %v199_v0, 0.0 }
 0x11c   :  { %v232_v7 = vmax.f32 %v210_v2, 0.0 }
 0x11d   :  { %v230_v9 = vmax.f32 %v202_v5, 0.0  ;;  %v414_v5 = vpop.permute.xlu0 %413 }
 0x11e   :  { %v246_v10 = vpack.c.bf16 %v232_v7, %v231_v6 }
 0x11f   :  { %v541_v12 = vpop.f32.mrb[4].mxu0  ;;  %v245_v13 = vpack.c.bf16 %v230_v9, %v229_v8  ;;  %v419_v9 = vpop.permute.xlu1 %418 }
 0x120   :  { %v223_v14 = vadd.f32 %v541_v12, %v100_v11  ;;  %v214_v15 = vpop.f32.mrb[5].mxu0 }
 0x121   :  { %v215_v17 = vadd.f32 %v214_v15, %v90_v63  ;;  %v542_v18 = vpop.f32.mrb[6].mxu0  ;;  %543 = vmatprep.subr.bf16.mxu1 %v245_v13 }
 0x122   :  { %v226_v19 = vadd.f32 %v542_v18, %v105_v16  ;;  %v217_v20 = vpop.f32.mrb[7].mxu0  ;;  %544 = vmatpush3.bf16.msra.mxu1 %v245_v13  ;;  %v235_v22 = vmax.f32 %v223_v14, 0.0 }
 0x123   :  { %v218_v21 = vadd.f32 %v217_v20, %v95_v4  ;;  %545 = vmatprep.subr.bf16.mxu1 %v246_v10  ;;  %v233_v24 = vmax.f32 %v215_v17, 0.0  ;;  %v592_v4 = vld [vmem:[%s802_s5] sm:$0xff]  }
 0x124   :  { %v236_v23 = vmax.f32 %v226_v19, 0.0 }
 0x125   :  { %v234_v25 = vmax.f32 %v218_v21, 0.0 }
 0x126   :  { %v248_v26 = vpack.c.bf16 %v236_v23, %v235_v22  ;;  %546 = vmatpush3.bf16.msra.mxu1 %v246_v10 }
 0x127   :  { %v247_v27 = vpack.c.bf16 %v234_v25, %v233_v24 }
 0x129   :  { %547 = vmatprep.subr.bf16.mxu1 %v247_v27 }
 0x12a   :  { %548 = vmatpush3.bf16.msra.mxu1 %v247_v27 }
 0x12b   :  { %549 = vmatprep.subr.bf16.mxu1 %v248_v26 }
 0x12e   :  { %550 = vmatpush3.bf16.msra.mxu1 %v248_v26 }
 0x12f   :  { %559 = vmatprep.subr.bf16.mxu1 %v594_v31 }
 0x131   :  { %552 = vmatmul.mubr.msk.bf16.vlgmr.msra.gmra.mrb[0].mxu1 %vm317_vm1, %v589_v28 }
 0x132   :  { %555 = vmatprep.mubr.msk.bf16.mxu1 %vm317_vm1, %v590_v29 }
 0x139   :  { %556 = vmatmul.mubr.msk.bf16.gmra.mrb[4].mxu1 %vm317_vm1, %v591_v30 }
 0x13a   :  { %567 = vmatprep.mubr.msk.bf16.mxu1 %vm595_vm2, %v594_v31 }
 0x204   :  { %v553_v36 = vpop.f32.mrb[0].mxu1 }
 0x205   :  { %v373_v37 = vadd.f32 %v553_v36, %v270_v34  ;;  %v364_v38 = vpop.f32.mrb[1].mxu1 }
 0x206   :  { %v365_v40 = vadd.f32 %v364_v38, %v260_v32  ;;  %v554_v41 = vpop.f32.mrb[2].mxu1 }
 0x207   :  { %v376_v42 = vadd.f32 %v554_v41, %v275_v35  ;;  %v367_v43 = vpop.f32.mrb[3].mxu1  ;;  %v397_v46 = vmax.f32 %v373_v37, 0.0 }
 0x208   :  { %v368_v45 = vadd.f32 %v367_v43, %v265_v33  ;;  %v395_v48 = vmax.f32 %v365_v40, 0.0 }
 0x209   :  { %v398_v47 = vmax.f32 %v376_v42, 0.0 }
 0x20a   :  { %v396_v49 = vmax.f32 %v368_v45, 0.0 }
 0x20b   :  { %v406_v50 = vpack.c.bf16 %v398_v47, %v397_v46 }
 0x20c   :  { %v405_v52 = vpack.c.bf16 %v396_v49, %v395_v48  ;;  %v557_v53 = vpop.f32.mrb[4].mxu1 }
 0x20d   :  { %v389_v54 = vadd.f32 %v557_v53, %v290_v51  ;;  %v380_v55 = vpop.f32.mrb[5].mxu1 }
 0x20e   :  { %v381_v57 = vadd.f32 %v380_v55, %v280_v39  ;;  %v558_v58 = vpop.f32.mrb[6].mxu1  ;;  %560 = vmatpush3.bf16.msra.mxu1 %v405_v52 }
 0x20f   :  { %v392_v59 = vadd.f32 %v558_v58, %v295_v56  ;;  %v383_v60 = vpop.f32.mrb[7].mxu1  ;;  %561 = vmatprep.subr.bf16.mxu1 %v594_v31  ;;  %v401_v62 = vmax.f32 %v389_v54, 0.0 }
 0x210   :  { %v384_v61 = vadd.f32 %v383_v60, %v285_v44  ;;  %v399_v0 = vmax.f32 %v381_v57, 0.0 }
 0x211   :  { %v402_v63 = vmax.f32 %v392_v59, 0.0 }
 0x212   :  { %v400_v1 = vmax.f32 %v384_v61, 0.0  ;;  %562 = vmatpush3.bf16.msra.mxu1 %v406_v50 }
 0x213   :  { %v408_v2 = vpack.c.bf16 %v402_v63, %v401_v62  ;;  %563 = vmatprep.subr.bf16.mxu1 %v594_v31 }
 0x214   :  { %v407_v3 = vpack.c.bf16 %v400_v1, %v399_v0 }
 0x216   :  { %564 = vmatpush3.bf16.msra.mxu1 %v407_v3 }
 0x217   :  { %565 = vmatprep.subr.bf16.mxu1 %v594_v31 }
 0x21a   :  { %566 = vmatpush3.bf16.msra.mxu1 %v408_v2 }
 0x21d   :  { %568 = vmatmul.mubr.msk.bf16.vlgmr.msra.gmra.mrb[8].mxu1 %vm317_vm1, %v592_v4 }
 0x2f0   :  { %v463_v6 = vpop.f32.mrb[8].mxu1 }
 0x2f1   :  { %v464_v7 = vadd.f32 %v463_v6, %v414_v5  ;;  %v569_v8 = vpop.f32.mrb[9].mxu1 }
 0x2f2   :  { %v466_v10 = vpop.f32.mrb[10].mxu1 }
 0x2f3   :  { %470 = vst [vmem:[%s803_s7] sm:$0xff] %v464_v7  ;;  %v467_v11 = vadd.f32 %v466_v10, %v419_v9  ;;  %v570_v12 = vpop.f32.mrb[11].mxu1 }
 0x2f5   :  { %471 = vst [vmem:[%s803_s7 + $0x8] sm:$0xff] %v467_v11 }

</bundles_post_ra>
